<compile_context>
chip_gen: v6e
topology: v6e:2x2x1
jax: 0.10.0
libtpu: 0.0.40
codegen_flags: <defaults>
</compile_context>

<pallas_src>
import functools

import jax
import jax.numpy as jnp
from jax.experimental import pallas as pl
from jax.experimental.pallas import tpu as pltpu


def _round_up(n, m):
    return ((n + m - 1) // m) * m


def _qnet_kernel(x_ref, w1_ref, b1_ref, w2_ref, b2_ref, o_ref):
    # hidden = relu(x @ W1 + b1)
    h = jnp.dot(x_ref[...], w1_ref[...], preferred_element_type=jnp.float32)
    h = jnp.maximum(h + b1_ref[...], 0.0)                 # (tile_b, hid)
    # out = hidden @ W2 + b2
    y = jnp.dot(h, w2_ref[...], preferred_element_type=jnp.float32)
    o_ref[...] = (y + b2_ref[...]).astype(o_ref.dtype)


@functools.partial(jax.jit, static_argnames=("tile_b",))
def linear_qnet_forward(x, w1, b1, w2, b2, *, tile_b=None):
    """x: (B, in) f32, w1: (in, hid), b1: (1, hid), w2: (hid, out), b2: (1, out).
    Returns (B, out) f32 == relu(x @ w1 + b1) @ w2 + b2."""
    B, in_f = x.shape
    hid = w1.shape[1]
    out_f = w2.shape[1]

    if tile_b is None:
        if B <= 1024:
            # Small batch: single (or few) steps; still a multiple of 8 sublanes.
            tile_b = _round_up(max(B, 1), 8)
        else:
            # Large batch: >=2 grid steps (keeps both v7x TensorCores busy),
            # capped so per-step x/out tiles stay small and step count stays low.
            tile_b = min(2048, _round_up(pl.cdiv(B, 2), 8))

    grid = (pl.cdiv(B, tile_b),)
    f32 = jnp.float32

    out = pl.pallas_call(
        _qnet_kernel,
        out_shape=jax.ShapeDtypeStruct((B, out_f), f32),
        grid=grid,
        in_specs=[
            pl.BlockSpec((tile_b, in_f), lambda i: (i, 0)),   # x: batch-tiled, true feature width
            pl.BlockSpec((in_f, hid), lambda i: (0, 0)),      # W1: VMEM-resident
            pl.BlockSpec((1, hid), lambda i: (0, 0)),         # b1: VMEM-resident
            pl.BlockSpec((hid, out_f), lambda i: (0, 0)),     # W2: VMEM-resident
            pl.BlockSpec((1, out_f), lambda i: (0, 0)),       # b2: VMEM-resident
        ],
        out_specs=pl.BlockSpec((tile_b, out_f), lambda i: (i, 0)),
        compiler_params=pltpu.CompilerParams(
            dimension_semantics=("parallel",)),
    )(x.astype(f32), w1.astype(f32), b1.astype(f32), w2.astype(f32), b2.astype(f32))

    return out


def init_params(key, input_size, hidden_size, output_size):
    """Deterministic PyTorch-style (uniform +/- 1/sqrt(fan_in)) init.
    Built once, outside the jitted forward — no per-call re-layout."""
    k1, k2, k3, k4 = jax.random.split(key, 4)
    lim1 = 1.0 / jnp.sqrt(jnp.float32(input_size))
    lim2 = 1.0 / jnp.sqrt(jnp.float32(hidden_size))
    w1 = jax.random.uniform(k1, (input_size, hidden_size), jnp.float32, -lim1, lim1)
    b1 = jax.random.uniform(k2, (1, hidden_size), jnp.float32, -lim1, lim1)
    w2 = jax.random.uniform(k3, (hidden_size, output_size), jnp.float32, -lim2, lim2)
    b2 = jax.random.uniform(k4, (1, output_size), jnp.float32, -lim2, lim2)
    return w1, b1, w2, b2


if __name__ == "__main__":
    # Snake-game Q-net sizes: 11 input features, 32 hidden, 3 actions.
    batch, input_size, hidden_size, output_size = 2, 11, 32, 3

    key = jax.random.PRNGKey(0)
    kx, kp = jax.random.split(key)
    x = jax.random.normal(kx, (batch, input_size), jnp.float32)
    w1, b1, w2, b2 = init_params(kp, input_size, hidden_size, output_size)

    out = jax.block_until_ready(linear_qnet_forward(x, w1, b1, w2, b2))

    # Pure-JAX reference (same math as the PyTorch forward).
    ref = jnp.maximum(x @ w1 + b1, 0.0) @ w2 + b2
    assert out.shape == (batch, output_size)
    assert jnp.allclose(out, ref, atol=1e-5, rtol=1e-5)

    # Multi-step grid path (B a multiple of the tile).
    big_b = 1024
    xb = jax.random.normal(jax.random.PRNGKey(1), (big_b, input_size), jnp.float32)
    out_big = jax.block_until_ready(linear_qnet_forward(xb, w1, b1, w2, b2))
    ref_big = jnp.maximum(xb @ w1 + b1, 0.0) @ w2 + b2
    assert out_big.shape == (big_b, output_size)
    assert jnp.allclose(out_big, ref_big, atol=1e-4, rtol=1e-4)

    # Ragged batch (exercises pl.cdiv grid + masked partial last block).
    odd_b = 600
    xo = jax.random.normal(jax.random.PRNGKey(2), (odd_b, input_size), jnp.float32)
    out_odd = jax.block_until_ready(linear_qnet_forward(xo, w1, b1, w2, b2))
    ref_odd = jnp.maximum(xo @ w1 + b1, 0.0) @ w2 + b2
    assert out_odd.shape == (odd_b, output_size)
    assert jnp.allclose(out_odd, ref_odd, atol=1e-4, rtol=1e-4)

    print("KERNEL_OK")
</pallas_src>

<mosaic_0001>
module attributes {stable_mosaic.version = 11 : i64} {
  func.func @_qnet_kernel(%arg0: i32, %arg1: memref<8x11xf32, #tpu.memory_space<vmem>>, %arg2: memref<11x32xf32, #tpu.memory_space<vmem>>, %arg3: memref<1x32xf32, #tpu.memory_space<vmem>>, %arg4: memref<32x3xf32, #tpu.memory_space<vmem>>, %arg5: memref<1x3xf32, #tpu.memory_space<vmem>>, %arg6: memref<8x3xf32, #tpu.memory_space<vmem>>) attributes {dimension_semantics = [#tpu.dimension_semantics<parallel>], iteration_bounds = array<i64: 1>, scalar_prefetch = 0 : i64, scratch_operands = 0 : i64, tpu.core_type = #tpu.core_type<tc>, window_params = [{transform_indices = @transform_0, window_bounds = array<i64: 8, 11>}, {pipeline_mode = #tpu.pipeline_mode<synchronous>, transform_indices = @transform_1, window_bounds = array<i64: 11, 32>}, {pipeline_mode = #tpu.pipeline_mode<synchronous>, transform_indices = @transform_2, window_bounds = array<i64: 1, 32>}, {pipeline_mode = #tpu.pipeline_mode<synchronous>, transform_indices = @transform_3, window_bounds = array<i64: 32, 3>}, {pipeline_mode = #tpu.pipeline_mode<synchronous>, transform_indices = @transform_4, window_bounds = array<i64: 1, 3>}, {transform_indices = @transform_5, window_bounds = array<i64: 8, 3>}]} {
    %c0 = arith.constant 0 : index
    %c0_0 = arith.constant 0 : index
    %0 = vector.load %arg1[%c0, %c0_0] : memref<8x11xf32, #tpu.memory_space<vmem>>, vector<8x11xf32>
    %c0_1 = arith.constant 0 : index
    %c0_2 = arith.constant 0 : index
    %1 = vector.load %arg2[%c0_1, %c0_2] : memref<11x32xf32, #tpu.memory_space<vmem>>, vector<11x32xf32>
    %cst = arith.constant dense<0.000000e+00> : vector<8x32xf32>
    %2 = tpu.matmul %0, %1, %cst {dimension_numbers = #tpu.dot_dimension_numbers<[1], [0], [0], [1], [0, 0, 1, 1], [], []>} : vector<8x11xf32>, vector<11x32xf32>, vector<8x32xf32> -> vector<8x32xf32>
    %c0_3 = arith.constant 0 : index
    %c0_4 = arith.constant 0 : index
    %3 = vector.load %arg3[%c0_3, %c0_4] : memref<1x32xf32, #tpu.memory_space<vmem>>, vector<1x32xf32>
    %4 = vector.broadcast %3 : vector<1x32xf32> to vector<8x32xf32>
    %5 = arith.addf %2, %4 : vector<8x32xf32>
    %cst_5 = arith.constant 0.000000e+00 : f32
    %6 = vector.broadcast %cst_5 : f32 to vector<8x32xf32>
    %7 = arith.maximumf %5, %6 : vector<8x32xf32>
    %c0_6 = arith.constant 0 : index
    %c0_7 = arith.constant 0 : index
    %8 = vector.load %arg4[%c0_6, %c0_7] : memref<32x3xf32, #tpu.memory_space<vmem>>, vector<32x3xf32>
    %cst_8 = arith.constant dense<0.000000e+00> : vector<8x3xf32>
    %9 = tpu.matmul %7, %8, %cst_8 {dimension_numbers = #tpu.dot_dimension_numbers<[1], [0], [0], [1], [0, 0, 1, 1], [], []>} : vector<8x32xf32>, vector<32x3xf32>, vector<8x3xf32> -> vector<8x3xf32>
    %c0_9 = arith.constant 0 : index
    %c0_10 = arith.constant 0 : index
    %10 = vector.load %arg5[%c0_9, %c0_10] : memref<1x3xf32, #tpu.memory_space<vmem>>, vector<1x3xf32>
    %11 = vector.broadcast %10 : vector<1x3xf32> to vector<8x3xf32>
    %12 = arith.addf %9, %11 : vector<8x3xf32>
    %c0_11 = arith.constant 0 : index
    %c0_12 = arith.constant 0 : index
    %13 = vector.load %arg6[%c0_11, %c0_12] : memref<8x3xf32, #tpu.memory_space<vmem>>, vector<8x3xf32>
    tpu.vector_store %arg6[%c0_11, %c0_12], %12 {strides = array<i32>} : memref<8x3xf32, #tpu.memory_space<vmem>>, vector<8x3xf32>,
    return
  }
  func.func @transform_0(%arg0: i32) -> (i32, i32) {
    %c0_i32 = arith.constant 0 : i32
    %c0_i32_0 = arith.constant 0 : i32
    return %arg0, %c0_i32 : i32, i32
  }
  func.func @transform_1(%arg0: i32) -> (i32, i32) {
    %c0_i32 = arith.constant 0 : i32
    %c0_i32_0 = arith.constant 0 : i32
    %c0_i32_1 = arith.constant 0 : i32
    return %c0_i32, %c0_i32_0 : i32, i32
  }
  func.func @transform_2(%arg0: i32) -> (i32, i32) {
    %c0_i32 = arith.constant 0 : i32
    %c0_i32_0 = arith.constant 0 : i32
    %c0_i32_1 = arith.constant 0 : i32
    return %c0_i32, %c0_i32_0 : i32, i32
  }
  func.func @transform_3(%arg0: i32) -> (i32, i32) {
    %c0_i32 = arith.constant 0 : i32
    %c0_i32_0 = arith.constant 0 : i32
    %c0_i32_1 = arith.constant 0 : i32
    return %c0_i32, %c0_i32_0 : i32, i32
  }
  func.func @transform_4(%arg0: i32) -> (i32, i32) {
    %c0_i32 = arith.constant 0 : i32
    %c0_i32_0 = arith.constant 0 : i32
    %c0_i32_1 = arith.constant 0 : i32
    return %c0_i32, %c0_i32_0 : i32, i32
  }
  func.func @transform_5(%arg0: i32) -> (i32, i32) {
    %c0_i32 = arith.constant 0 : i32
    %c0_i32_0 = arith.constant 0 : i32
    return %arg0, %c0_i32 : i32, i32
  }
}

</mosaic_0001>

<bundles_post_ra>
// kernel: linear_qnet_forward.1
= control target key start
LH: loop header
LB: loop body
LE: loop exit
PB: predicated region body
PF: predicated region fallthrough
CT: control target
= control target key end

     0   :  { %10 = vsyncpa [#allocation3], 0  ;;  %vm35_vm0 = vcmask 1042432   ;;  %v271_v1 = vmov 0.0   ;;  %vm272_vm1 = vmmov 0   ;;  %vm31_vm2 = vcmask 89088   ;;  %s336_s0 = inlined_call_operand.vmem [shape: f32[2,11], index: 0, kind: input, shape index: {}]   ;;  %s337_s1 = inlined_call_operand.vmem [shape: f32[11,32], index: 1, kind: input, shape index: {}]   ;;  %s338_s2 = inlined_call_operand.vmem [shape: f32[1,32], index: 2, kind: input, shape index: {}]   ;;  %s339_s3 = inlined_call_operand.vmem [shape: f32[32,3], index: 3, kind: input, shape index: {}]   ;;  %s340_s4 = inlined_call_operand.vmem [shape: f32[1,3], index: 4, kind: input, shape index: {}]   ;;  %s341_s5 = inlined_call_operand.hbm [shape: f32[2,3], index: 5, kind: output, shape index: {}]  }
   0x1   :  { %v23_v0 = vld [vmem:[%s337_s1 + $0x8] sm:$0x7]  ;;  %226 = vmatprep.subr.mxu0 %v271_v1  ;;  %v22_v2 = vld [vmem:[%s337_s1] sm:$0xff]  ;;  %233 = vmatprep.subr.mxu1 %v271_v1  ;;  %v113_v3 = vld [vmem:[%s339_s3 + $0x18] sm:$0xff]  ;;  %vm121_vm3 = vcmask 261120   ;;  %vm195_vm4 = vcmask 23552  }
   0x2   :  { %227 = vmatpush3.msk.msra.mxu0 %vm35_vm0, %v23_v0  ;;  %230 = vmatprep.mubr.msk.f32.mxu0 %vm272_vm1, %v271_v1  ;;  %v21_v4 = vld [vmem:[%s336_s0] sm:$0xff]  ;;  %v112_v5 = vld [vmem:[%s339_s3 + $0x10] sm:$0xff]  ;;  %v111_v6 = vld [vmem:[%s339_s3 + $0x8] sm:$0xff] }
   0x3   :  { %228 = vmatprep.subr.mxu0 %v271_v1  ;;  %234 = vmatpush3.msra.mxu1 %v113_v3  ;;  %v110_v7 = vld [vmem:[%s339_s3] sm:$0xff] }
   0x4   :  { %229 = vmatpush3.msra.mxu0 %v22_v2  ;;  %235 = vmatprep.subr.mxu1 %v271_v1  ;;  %v213_v8 = vld [vmem:[%s338_s2] ss:$0 sm:$0xff] }
   0x5   :  { %231 = vmatmul.mubr.msk.f32.vlgmr.msra.gmra.mxu0 %vm31_vm2, %v21_v4  ;;  %241 = vmatprep.mubr.msk.f32.mxu1 %vm272_vm1, %v271_v1  ;;  %v216_v13 = vld [vmem:[%s340_s4] ss:$0 sm:$0xff] }
   0x6   :  { %236 = vmatpush3.msra.mxu1 %v112_v5 }
   0x7   :  { %237 = vmatprep.subr.mxu1 %v271_v1 }
   0x8   :  { %238 = vmatpush3.msra.mxu1 %v111_v6 }
   0x9   :  { %239 = vmatprep.subr.mxu1 %v271_v1 }
   0xa   :  { %240 = vmatpush3.msra.mxu1 %v110_v7 }
  0xc5   :  { %v105_v9 = vpop.f32.mrf.mxu0 }
  0xc6   :  { %v106_v10 = vadd.f32 %v213_v8, %v105_v9 }
  0xc7   :  { %v232_v11 = vpop.f32.mrf.mxu0 }
  0xc8   :  { %v109_v12 = vmax.f32 %v106_v10, 0.0 }
  0xca   :  { %242 = vmatmul.mubr.msk.f32.vlgmr.msra.gmra.mxu1 %vm121_vm3, %v109_v12 }
 0x18a   :  { %v191_v14 = vpop.f32.mrf.mxu1 }
 0x18b   :  { %v192_v15 = vadd.f32 %v216_v13, %v191_v14 }
 0x18c   :  { %v243_v16 = vpop.f32.mrf.mxu1 }
 0x18d   :  { %196 = vst.msk [vmem:[#allocation2] sm:$0xff] %vm195_vm4, %v192_v15 }
 0x18e   :  { %201 = vsyncadd [#allocation3], 96  ;;  %s273_s3 = smov [#allocation2]  }
 0x18f   :  { %s202_s9 = sshll.u32 %s273_s3, 4  ;;  %s203_s9 = int_to_ptr.vmem [resolvable:$true] %s202_s9 }
 0x190   :  { %s249_s2 = scalar_lea.vmem %s203_s9, 32  ;;  %s253_s10 = scalar_lea.vmem %s203_s9, 128 }
 0x191   :  { %p250_p0 = scmp.ne.s32.totalorder %s203_s9, %s249_s2  ;;  %p254_p1 = scmp.lt.s32.totalorder %s203_s9, %s203_s9 }
 0x192   :  { %p255_p2 = scmp.lt.s32.totalorder %s253_s10, %s249_s2 }
 0x194   :  { %p256_p3 = por %p255_p2, %p254_p1 }
 0x196   :  { %p257_p4 = pnand %p256_p3, %p250_p0 }
 0x198   :  { %260 = shalt.err (!%p257_p4)
}
 0x199   :  { %s274_s11 = smov 32   ;;  %s275_s12 = smov 2  }
 0x19a   :  { %208 = dma.vmem_to_hbm [thread:$0]  %s203_s9, 32, %s341_s5, [#allocation3], %s274_s11, %s274_s11, %s275_s12  }
 0x19b   :  { %269 = dma.done.wait [#allocation3], 128  }
 0x19c   :  { %270 = vsyncadd [#allocation3], 4294967168 }
 0x19d   :  { %212 = vsyncpa [#allocation3], 1 }

</bundles_post_ra>
